<compile_context>
chip_gen: v6e
topology: v6e:2x2x1
jax: 0.10.0
libtpu: 0.0.40
codegen_flags: <defaults>
</compile_context>

<pallas_src>
import functools
import math

import jax
import jax.numpy as jnp
from jax import lax
from jax.experimental import pallas as pl
from jax.experimental.pallas import tpu as pltpu


# ---------------------------------------------------------------------------
# Kernel
# ---------------------------------------------------------------------------
def _mha_attn_kernel(*refs, has_mask, causal, compute_dtype, exact_softmax):
    if has_mask:
        (q_ref, k_ref, v_ref, mask_ref, wo_ref, bo_ref, out_ref, acc_ref) = refs
    else:
        (q_ref, k_ref, v_ref, wo_ref, bo_ref, out_ref, acc_ref) = refs
        mask_ref = None

    g, tq, d_k = q_ref.shape          # heads per group, query tile, head dim
    s_kv = k_ref.shape[1]             # key/value sequence length
    hg = pl.program_id(2)             # head-group index (reduction axis)

    @pl.when(hg == 0)
    def _init():
        acc_ref[...] = jnp.zeros_like(acc_ref)

    # This step's head group, sliced out of the batch-resident K/V blocks.
    h0 = pl.multiple_of(hg * g, g)
    qh = q_ref[...]                   # (G, tq, d_k) compute_dtype, scale folded in
    kh = k_ref[pl.ds(h0, g)]          # (G, S,  d_k)
    vh = v_ref[pl.ds(h0, g)]          # (G, S,  d_k)

    # Scores for all G heads at once (batched MXU matmul, f32 accumulation).
    scores = lax.dot_general(qh, kh, (((2,), (2,)), ((0,), (0,))),
                             preferred_element_type=jnp.float32)      # (G, tq, S)

    if has_mask:
        scores = jnp.where(mask_ref[0][None, :, :] == 0,
                           jnp.float32(-1e9), scores)
    elif causal:
        q0 = pl.program_id(1) * tq
        rows = q0 + lax.broadcasted_iota(jnp.int32, (tq, s_kv), 0)
        cols = lax.broadcasted_iota(jnp.int32, (tq, s_kv), 1)
        scores = jnp.where((cols <= rows)[None, :, :],
                           scores, jnp.float32(-1e9))

    # Numerically stable softmax; all statistics stay in f32.
    m = jnp.max(scores, axis=-1, keepdims=True)                       # (G, tq, 1)
    e = jnp.exp(scores - m)                                           # (G, tq, S)
    denom = jnp.sum(e, axis=-1, keepdims=True)                        # (G, tq, 1)
    if exact_softmax:
        p = e / denom                                                 # exact f32 path
    else:
        p = e * pl.reciprocal(denom, approx=True)                     # EUP slot
    p = p.astype(compute_dtype)

    # P@V produced directly in transposed (d_k, tq) orientation so the G heads
    # flatten into one wide (G*d_k) contraction for the output projection.
    ctx_t = lax.dot_general(vh, p, (((1,), (2,)), ((0,), (0,))),
                            preferred_element_type=jnp.float32)       # (G, d_k, tq)

    wo_hg = wo_ref[hg]                                                # (G*d_k, D)
    if d_k % 8 == 0:
        # Tile-aligned leading-dim merge (free relayout), then a single matmul
        # with contraction width G*d_k.
        ctx2 = ctx_t.reshape(g * d_k, tq).astype(compute_dtype)
        acc_ref[...] += lax.dot_general(ctx2, wo_hg,
                                        (((0,), (0,)), ((), ())),
                                        preferred_element_type=jnp.float32)
    else:
        # Fallback for sublane-unaligned d_k: per-head contractions.
        for i in range(g):
            acc_ref[...] += lax.dot_general(
                ctx_t[i].astype(compute_dtype),
                wo_hg[i * d_k:(i + 1) * d_k],
                (((0,), (0,)), ((), ())),
                preferred_element_type=jnp.float32)

    @pl.when(hg == pl.num_programs(2) - 1)
    def _finalize():
        out_ref[0] = (acc_ref[...] + bo_ref[...]).astype(out_ref.dtype)


# ---------------------------------------------------------------------------
# Wrapper helpers
# ---------------------------------------------------------------------------
def _round_up(x, m):
    return ((x + m - 1) // m) * m


def _tpu_defaults():
    """Per-generation (q-tile cap, vmem limit, vmem capacity, MXU width)."""
    q_cap, vmem_limit = 256, 64 * 1024 * 1024
    vmem_cap, mxu = 128 * 1024 * 1024, 256
    try:
        info = pltpu.get_tpu_info()
        vmem_cap = int(getattr(info, "vmem_capacity_bytes", 0) or vmem_cap)
        name = str(getattr(info, "chip_version", "")).lower()
        if vmem_cap and vmem_cap <= 80 * 1024 * 1024:
            q_cap, vmem_limit, mxu = 256, 48 * 1024 * 1024, 256   # v7x: 64 MiB VMEM
        elif "5" in name:
            q_cap, vmem_limit, mxu = 128, 96 * 1024 * 1024, 128   # v5e: spill sensitive
        else:
            q_cap, vmem_limit, mxu = 512, 96 * 1024 * 1024, 256   # v5e/v6e: 128 MiB VMEM
    except Exception:
        pass
    return q_cap, vmem_limit, vmem_cap, mxu


def _pick_head_group(num_heads, d_k, target):
    """Smallest divisor G of num_heads with G*d_k >= target (MXU-native width)."""
    for g in range(1, num_heads + 1):
        if num_heads % g == 0 and g * d_k >= target:
            return g
    return num_heads


def _pick_q_tile(seq_len, batch, group, kv_len, cap):
    tq = min(_round_up(seq_len, 8), _round_up(cap, 8))
    # Bound the (G, tq, S) f32 score tile (~8 MiB) to limit vreg spill.
    while group * tq * kv_len * 4 > 8 * 1024 * 1024 and tq > 128:
        tq = _round_up(tq // 2, 8)
    # Megacore (v7x): keep at least 2 steps on the parallel grid axes.
    if batch * pl.cdiv(seq_len, tq) < 2 and tq >= 16:
        tq = _round_up(pl.cdiv(tq, 2), 8)
    return tq


def _kv_spec(block_shape, index_map, single_buffer):
    # K/V block index only changes per batch; on the 64 MiB-VMEM part drop to a
    # single buffer when the resident slab is large (one stall per batch change).
    if single_buffer:
        try:
            return pl.BlockSpec(block_shape, index_map, pipeline_mode=pl.Buffered(1))
        except TypeError:
            pass
    return pl.BlockSpec(block_shape, index_map)


# ---------------------------------------------------------------------------
# Public entry point
# ---------------------------------------------------------------------------
def multi_head_attention(q, k, v, params, num_heads, mask=None, *,
                         causal=False, compute_dtype=jnp.bfloat16):
    """q, k, v: (B, S, D). mask: optional (B, S, S) with 0 => masked out.
    causal=True generates the causal mask in-kernel (no (B,S,S) tensor streamed)."""
    B, S, D = q.shape
    H = num_heads
    d_k = D // H
    out_dtype = q.dtype
    wq, bq, wk, bk, wv, bv, wo, bo = params

    q_cap, vmem_limit, vmem_cap, mxu = _tpu_defaults()
    G = _pick_head_group(H, d_k, target=mxu)
    HG = H // G
    tq = _pick_q_tile(S, B, G, S, q_cap)
    sq_pad = pl.cdiv(S, tq) * tq

    # ---- Input projections as plain XLA GEMMs (full D-wide MXU work, once). ----
    # 1/sqrt(d_k) is folded into W_q / b_q so the kernel never rescales scores.
    scale = 1.0 / math.sqrt(d_k)
    hi = lax.Precision.HIGHEST

    def to_heads(x):                       # (B, S, D) -> (B, H, S, d_k)
        return x.reshape(B, S, H, d_k).transpose(0, 2, 1, 3)

    qh = to_heads(jnp.einsum("bsd,de->bse", q, wq * scale, precision=hi) + bq * scale)
    kh = to_heads(jnp.einsum("bsd,de->bse", k, wk, precision=hi) + bk)
    vh = to_heads(jnp.einsum("bsd,de->bse", v, wv, precision=hi) + bv)
    if sq_pad > S:
        qh = jnp.pad(qh, ((0, 0), (0, 0), (0, sq_pad - S), (0, 0)))
    qh = qh.reshape(B * H, sq_pad, d_k).astype(compute_dtype)
    kh = kh.reshape(B * H, S, d_k).astype(compute_dtype)
    vh = vh.reshape(B * H, S, d_k).astype(compute_dtype)

    # Output projection weights packed per head group, resident in VMEM.
    wo_g = wo.reshape(HG, G * d_k, D).astype(compute_dtype)
    bo_2d = bo.reshape(1, D).astype(jnp.float32)

    has_mask = mask is not None
    kv_bytes = H * S * d_k * jnp.dtype(compute_dtype).itemsize
    single_buf_kv = (vmem_cap <= 80 * 1024 * 1024) and (kv_bytes > 4 * 1024 * 1024)

    grid = (B, sq_pad // tq, HG)
    q_spec = pl.BlockSpec((G, tq, d_k), lambda b, qi, hg: (b * HG + hg, qi, 0))
    kv_spec = _kv_spec((H, S, d_k), lambda b, qi, hg: (b, 0, 0), single_buf_kv)
    wo_spec = pl.BlockSpec((HG, G * d_k, D), lambda b, qi, hg: (0, 0, 0))
    bo_spec = pl.BlockSpec((1, D), lambda b, qi, hg: (0, 0))
    out_spec = pl.BlockSpec((1, tq, D), lambda b, qi, hg: (b, qi, 0))

    inputs = [qh, kh, vh]
    in_specs = [q_spec, kv_spec, kv_spec]
    if has_mask:
        m8 = (mask != 0).astype(jnp.int8)          # int8 => 4x fewer DMA bytes vs f32
        if sq_pad > S:
            m8 = jnp.pad(m8, ((0, 0), (0, sq_pad - S), (0, 0)), constant_values=1)
        inputs.append(m8)
        in_specs.append(pl.BlockSpec((1, tq, S), lambda b, qi, hg: (b, qi, 0)))
    inputs += [wo_g, bo_2d]
    in_specs += [wo_spec, bo_spec]

    kernel = functools.partial(
        _mha_attn_kernel,
        has_mask=has_mask,
        causal=bool(causal) and not has_mask,
        compute_dtype=compute_dtype,
        exact_softmax=(jnp.dtype(compute_dtype) == jnp.dtype(jnp.float32)),
    )

    out = pl.pallas_call(
        kernel,
        out_shape=jax.ShapeDtypeStruct((B, sq_pad, D), out_dtype),
        grid_spec=pltpu.PrefetchScalarGridSpec(
            num_scalar_prefetch=0,
            grid=grid,
            in_specs=in_specs,
            out_specs=out_spec,
            scratch_shapes=[pltpu.VMEM((tq, D), jnp.float32)],
        ),
        compiler_params=pltpu.CompilerParams(
            dimension_semantics=("parallel", "parallel", "arbitrary"),
            vmem_limit_bytes=vmem_limit,
        ),
    )(*inputs)
    return out[:, :S, :] if sq_pad > S else out


# ---------------------------------------------------------------------------
# Params / pure-JAX reference
# ---------------------------------------------------------------------------
def init_params(key, d_model):
    """Init mirroring torch.nn.Linear defaults; weights stored as (in, out)."""
    bound = 1.0 / math.sqrt(d_model)
    keys = jax.random.split(key, 8)
    params = []
    for i in range(4):
        w = jax.random.uniform(keys[2 * i], (d_model, d_model),
                               minval=-bound, maxval=bound, dtype=jnp.float32)
        b = jax.random.uniform(keys[2 * i + 1], (d_model,),
                               minval=-bound, maxval=bound, dtype=jnp.float32)
        params += [w, b]
    return tuple(params)


def reference_mha(q, k, v, params, num_heads, mask=None):
    """Pure-JAX f32 reference reproducing the PyTorch forward exactly."""
    B, S, D = q.shape
    d_k = D // num_heads
    wq, bq, wk, bk, wv, bv, wo, bo = params
    hi = lax.Precision.HIGHEST

    def split(x):
        return x.reshape(B, S, num_heads, d_k).transpose(0, 2, 1, 3)

    Q = split(jnp.einsum("bsd,de->bse", q, wq, precision=hi) + bq)
    K = split(jnp.einsum("bsd,de->bse", k, wk, precision=hi) + bk)
    V = split(jnp.einsum("bsd,de->bse", v, wv, precision=hi) + bv)
    scores = jnp.einsum("bhqd,bhkd->bhqk", Q, K, precision=hi) / math.sqrt(d_k)
    if mask is not None:
        scores = jnp.where(mask[:, None, :, :] == 0, -1e9, scores)
    probs = jax.nn.softmax(scores, axis=-1)
    out = jnp.einsum("bhqk,bhkd->bhqd", probs, V, precision=hi)
    out = out.transpose(0, 2, 1, 3).reshape(B, S, D)
    return jnp.einsum("bsd,de->bse", out, wo, precision=hi) + bo


# ---------------------------------------------------------------------------
# Demo / self-test
# ---------------------------------------------------------------------------
if __name__ == "__main__":
    B, S, D, H = 2, 8, 32, 4

    key = jax.random.PRNGKey(0)
    kq, kk, kv_, kp = jax.random.split(key, 4)
    q = jax.random.normal(kq, (B, S, D), dtype=jnp.float32)
    k = jax.random.normal(kk, (B, S, D), dtype=jnp.float32)
    v = jax.random.normal(kv_, (B, S, D), dtype=jnp.float32)
    params = init_params(kp, D)

    # 1) mask=None, exact f32 compute path (exact softmax division, f32 MXU).
    out_f32 = jax.block_until_ready(
        multi_head_attention(q, k, v, params, num_heads=H,
                             compute_dtype=jnp.float32))
    ref = reference_mha(q, k, v, params, num_heads=H)
    assert out_f32.shape == (B, S, D)
    assert jnp.allclose(out_f32, ref, atol=2e-3, rtol=2e-3), "f32 no-mask mismatch"

    causal_mask = jnp.broadcast_to(jnp.tril(jnp.ones((S, S), jnp.int32)), (B, S, S))
    ref_causal = reference_mha(q, k, v, params, num_heads=H, mask=causal_mask)

    # 2) causal mask generated in-kernel (no mask tensor streamed), bf16 MXU.
    out_causal = jax.block_until_ready(
        multi_head_attention(q, k, v, params, num_heads=H, causal=True,
                             compute_dtype=jnp.bfloat16))
    assert out_causal.shape == (B, S, D)
    assert jnp.allclose(out_causal, ref_causal, atol=5e-2, rtol=5e-2), \
        "bf16 causal mismatch"

    # 3) explicit user mask streamed as int8, exact f32 path.
    out_masked = jax.block_until_ready(
        multi_head_attention(q, k, v, params, num_heads=H, mask=causal_mask,
                             compute_dtype=jnp.float32))
    assert jnp.allclose(out_masked, ref_causal, atol=2e-3, rtol=2e-3), \
        "f32 masked mismatch"

    print("KERNEL_OK")
</pallas_src>

<mosaic_0001>
module attributes {stable_mosaic.version = 11 : i64} {
  func.func @_mha_attn_kernel(%arg0: i32, %arg1: i32, %arg2: i32, %arg3: memref<4x8x8xf32, #tpu.memory_space<vmem>>, %arg4: memref<4x8x8xf32, #tpu.memory_space<vmem>>, %arg5: memref<4x8x8xf32, #tpu.memory_space<vmem>>, %arg6: memref<1x32x32xf32, #tpu.memory_space<vmem>>, %arg7: memref<1x32xf32, #tpu.memory_space<vmem>>, %arg8: memref<1x8x32xf32, #tpu.memory_space<vmem>>, %arg9: memref<8x32xf32, #tpu.memory_space<vmem>>) attributes {dimension_semantics = [#tpu.dimension_semantics<parallel>, #tpu.dimension_semantics<parallel>, #tpu.dimension_semantics<arbitrary>], iteration_bounds = array<i64: 2, 1, 1>, scalar_prefetch = 0 : i64, scratch_operands = 1 : i64, tpu.core_type = #tpu.core_type<tc>, window_params = [{transform_indices = @transform_0, window_bounds = array<i64: 4, 8, 8>}, {transform_indices = @transform_1, window_bounds = array<i64: 4, 8, 8>}, {transform_indices = @transform_2, window_bounds = array<i64: 4, 8, 8>}, {pipeline_mode = #tpu.pipeline_mode<synchronous>, transform_indices = @transform_3, window_bounds = array<i64: 1, 32, 32>}, {pipeline_mode = #tpu.pipeline_mode<synchronous>, transform_indices = @transform_4, window_bounds = array<i64: 1, 32>}, {transform_indices = @transform_5, window_bounds = array<i64: 1, 8, 32>}]} {
    %c0_i32 = arith.constant 0 : i32
    %0 = arith.cmpi eq, %arg2, %c0_i32 : i32
    %1 = arith.extui %0 : i1 to i32
    %c0_i32_0 = arith.constant 0 : i32
    %2 = arith.cmpi ne, %1, %c0_i32_0 : i32
    scf.if %2 {
      %cst_19 = arith.constant 0.000000e+00 : f32
      %32 = vector.broadcast %cst_19 : f32 to vector<8x32xf32>
      %c0_20 = arith.constant 0 : index
      %c0_21 = arith.constant 0 : index
      %33 = vector.load %arg9[%c0_20, %c0_21] : memref<8x32xf32, #tpu.memory_space<vmem>>, vector<8x32xf32>
      tpu.vector_store %arg9[%c0_20, %c0_21], %32 {strides = array<i32>} : memref<8x32xf32, #tpu.memory_space<vmem>>, vector<8x32xf32>,
    } else {
    }
    %c4_i32 = arith.constant 4 : i32
    %3 = arith.muli %arg2, %c4_i32 : i32
    %4 = tpu.assume_multiple %3, 4 : i32
    %c0 = arith.constant 0 : index
    %c0_1 = arith.constant 0 : index
    %c0_2 = arith.constant 0 : index
    %5 = vector.load %arg3[%c0, %c0_1, %c0_2] : memref<4x8x8xf32, #tpu.memory_space<vmem>>, vector<4x8x8xf32>
    %6 = arith.index_cast %4 : i32 to index
    %c0_3 = arith.constant 0 : index
    %c0_4 = arith.constant 0 : index
    %7 = vector.load %arg4[%6, %c0_3, %c0_4] : memref<4x8x8xf32, #tpu.memory_space<vmem>>, vector<4x8x8xf32>
    %8 = arith.index_cast %4 : i32 to index
    %c0_5 = arith.constant 0 : index
    %c0_6 = arith.constant 0 : index
    %9 = vector.load %arg5[%8, %c0_5, %c0_6] : memref<4x8x8xf32, #tpu.memory_space<vmem>>, vector<4x8x8xf32>
    %cst = arith.constant dense<0.000000e+00> : vector<4x8x8xf32>
    %10 = tpu.matmul %5, %7, %cst {dimension_numbers = #tpu.dot_dimension_numbers<[2], [2], [1], [1], [0, 0, 0, 1, 1, 1], [0], [0]>} : vector<4x8x8xf32>, vector<4x8x8xf32>, vector<4x8x8xf32> -> vector<4x8x8xf32>
    %cst_7 = arith.constant dense<0xFF800000> : vector<4x8xf32>
    %11 = vector.multi_reduction <maximumf>, %10, %cst_7 [2] : vector<4x8x8xf32> to vector<4x8xf32>
    %12 = vector.shape_cast %11 : vector<4x8xf32> to vector<4x8x1xf32>
    %13 = vector.broadcast %12 : vector<4x8x1xf32> to vector<4x8x8xf32>
    %14 = arith.subf %10, %13 : vector<4x8x8xf32>
    %15 = math.exp %14 : vector<4x8x8xf32>
    %cst_8 = arith.constant dense<0.000000e+00> : vector<4x8xf32>
    %16 = vector.multi_reduction <add>, %15, %cst_8 [2] : vector<4x8x8xf32> to vector<4x8xf32>
    %17 = vector.shape_cast %16 : vector<4x8xf32> to vector<4x8x1xf32>
    %18 = vector.broadcast %17 : vector<4x8x1xf32> to vector<4x8x8xf32>
    %19 = arith.divf %15, %18 : vector<4x8x8xf32>
    %cst_9 = arith.constant dense<0.000000e+00> : vector<4x8x8xf32>
    %20 = tpu.matmul %9, %19, %cst_9 {dimension_numbers = #tpu.dot_dimension_numbers<[1], [2], [2], [1], [0, 0, 0, 2, 1, 1], [0], [0]>} : vector<4x8x8xf32>, vector<4x8x8xf32>, vector<4x8x8xf32> -> vector<4x8x8xf32>
    %21 = arith.index_cast %arg2 : i32 to index
    %c0_10 = arith.constant 0 : index
    %c0_11 = arith.constant 0 : index
    %22 = vector.load %arg6[%21, %c0_10, %c0_11] : memref<1x32x32xf32, #tpu.memory_space<vmem>>, vector<1x32x32xf32>
    %23 = vector.shape_cast %22 : vector<1x32x32xf32> to vector<32x32xf32>
    %24 = vector.shape_cast %20 : vector<4x8x8xf32> to vector<32x8xf32>
    %c0_12 = arith.constant 0 : index
    %c0_13 = arith.constant 0 : index
    %25 = vector.load %arg9[%c0_12, %c0_13] : memref<8x32xf32, #tpu.memory_space<vmem>>, vector<8x32xf32>
    %cst_14 = arith.constant dense<0.000000e+00> : vector<8x32xf32>
    %26 = tpu.matmul %24, %23, %cst_14 {dimension_numbers = #tpu.dot_dimension_numbers<[0], [0], [1], [1], [0, 1, 1, 1], [], []>} : vector<32x8xf32>, vector<32x32xf32>, vector<8x32xf32> -> vector<8x32xf32>
    %27 = arith.addf %25, %26 : vector<8x32xf32>
    %c0_15 = arith.constant 0 : index
    %c0_16 = arith.constant 0 : index
    %28 = vector.load %arg9[%c0_15, %c0_16] : memref<8x32xf32, #tpu.memory_space<vmem>>, vector<8x32xf32>
    tpu.vector_store %arg9[%c0_15, %c0_16], %27 {strides = array<i32>} : memref<8x32xf32, #tpu.memory_space<vmem>>, vector<8x32xf32>,
    %c0_i32_17 = arith.constant 0 : i32
    %29 = arith.cmpi eq, %arg2, %c0_i32_17 : i32
    %30 = arith.extui %29 : i1 to i32
    %c0_i32_18 = arith.constant 0 : i32
    %31 = arith.cmpi ne, %30, %c0_i32_18 : i32
    scf.if %31 {
      %c0_19 = arith.constant 0 : index
      %c0_20 = arith.constant 0 : index
      %32 = vector.load %arg9[%c0_19, %c0_20] : memref<8x32xf32, #tpu.memory_space<vmem>>, vector<8x32xf32>
      %c0_21 = arith.constant 0 : index
      %c0_22 = arith.constant 0 : index
      %33 = vector.load %arg7[%c0_21, %c0_22] : memref<1x32xf32, #tpu.memory_space<vmem>>, vector<1x32xf32>
      %34 = vector.broadcast %33 : vector<1x32xf32> to vector<8x32xf32>
      %35 = arith.addf %32, %34 : vector<8x32xf32>
      %c0_23 = arith.constant 0 : index
      %c0_24 = arith.constant 0 : index
      %c0_25 = arith.constant 0 : index
      %36 = vector.load %arg8[%c0_23, %c0_24, %c0_25] : memref<1x8x32xf32, #tpu.memory_space<vmem>>, vector<1x8x32xf32>
      %37 = vector.shape_cast %36 : vector<1x8x32xf32> to vector<8x32xf32>
      %38 = vector.shape_cast %35 : vector<8x32xf32> to vector<1x8x32xf32>
      tpu.vector_store %arg8[%c0_23, %c0_24, %c0_25], %38 {strides = array<i32>} : memref<1x8x32xf32, #tpu.memory_space<vmem>>, vector<1x8x32xf32>,
    } else {
    }
    return
  }
  func.func @transform_0(%arg0: i32, %arg1: i32, %arg2: i32) -> (i32, i32, i32) {
    %c1_i32 = arith.constant 1 : i32
    %0 = arith.muli %arg0, %c1_i32 : i32
    %1 = arith.addi %0, %arg2 : i32
    %c0_i32 = arith.constant 0 : i32
    %c0_i32_0 = arith.constant 0 : i32
    return %1, %arg1, %c0_i32 : i32, i32, i32
  }
  func.func @transform_1(%arg0: i32, %arg1: i32, %arg2: i32) -> (i32, i32, i32) {
    %c0_i32 = arith.constant 0 : i32
    %c0_i32_0 = arith.constant 0 : i32
    %c0_i32_1 = arith.constant 0 : i32
    return %arg0, %c0_i32, %c0_i32_0 : i32, i32, i32
  }
  func.func @transform_2(%arg0: i32, %arg1: i32, %arg2: i32) -> (i32, i32, i32) {
    %c0_i32 = arith.constant 0 : i32
    %c0_i32_0 = arith.constant 0 : i32
    %c0_i32_1 = arith.constant 0 : i32
    return %arg0, %c0_i32, %c0_i32_0 : i32, i32, i32
  }
  func.func @transform_3(%arg0: i32, %arg1: i32, %arg2: i32) -> (i32, i32, i32) {
    %c0_i32 = arith.constant 0 : i32
    %c0_i32_0 = arith.constant 0 : i32
    %c0_i32_1 = arith.constant 0 : i32
    %c0_i32_2 = arith.constant 0 : i32
    return %c0_i32, %c0_i32_0, %c0_i32_1 : i32, i32, i32
  }
  func.func @transform_4(%arg0: i32, %arg1: i32, %arg2: i32) -> (i32, i32) {
    %c0_i32 = arith.constant 0 : i32
    %c0_i32_0 = arith.constant 0 : i32
    %c0_i32_1 = arith.constant 0 : i32
    return %c0_i32, %c0_i32_0 : i32, i32
  }
  func.func @transform_5(%arg0: i32, %arg1: i32, %arg2: i32) -> (i32, i32, i32) {
    %c0_i32 = arith.constant 0 : i32
    %c0_i32_0 = arith.constant 0 : i32
    return %arg0, %arg1, %c0_i32 : i32, i32, i32
  }
}

</mosaic_0001>

<bundles_post_ra>
// kernel: tpu_custom_call.1
= control target key start
LH: loop header
LB: loop body
LE: loop exit
PB: predicated region body
PF: predicated region fallthrough
CT: control target
= control target key end

     0   :  { %s2213_s0 = inlined_call_operand.hbm [shape: f32[8,8,8], index: 0, kind: input, shape index: {}]   ;;  %s2214_s1 = inlined_call_operand.hbm [shape: f32[8,8,8], index: 1, kind: input, shape index: {}]   ;;  %s2215_s2 = inlined_call_operand.hbm [shape: f32[8,8,8], index: 2, kind: input, shape index: {}]   ;;  %s2216_s3 = inlined_call_operand.hbm [shape: f32[1,32,32], index: 3, kind: input, shape index: {}]   ;;  %s2217_s4 = inlined_call_operand.vmem [shape: f32[1,32], index: 4, kind: input, shape index: {}]   ;;  %s2218_s5 = inlined_call_operand.hbm [shape: f32[2,8,32], index: 5, kind: output, shape index: {}]  }
   0x1   :  { %2228 = sst [smem:[#allocation19_spill]] %s2213_s0 }
   0x2   :  { %2229 = sst [smem:[#allocation20_spill]] %s2214_s1 }
   0x3   :  { %10 = vsyncpa [#allocation4], 0 }
   0x4   :  { %12 = vsyncpa [#allocation4 + $0x1], 0 }
   0x5   :  { %13 = vsyncpa [#allocation7], 0 }
   0x6   :  { %15 = vsyncpa [#allocation7 + $0x1], 0 }
   0x7   :  { %16 = vsyncpa [#allocation10], 0 }
   0x8   :  { %17 = vsyncpa [#allocation5], 0 }
   0x9   :  { %19 = vsyncpa [#allocation5 + $0x1], 0  ;;  %s1915_s18 = smov 0   ;;  %s1917_s19 = smov 0  }
   0xa   :  { %s1919_s20 = smov 0   ;;  %s1921_s21 = smov 0  }
   0xb   :  { %s1923_s22 = smov 0   ;;  %s1925_s23 = smov 0  }
   0xc LB: > { %2230 = sst [smem:[#allocation16_spill]] %s1870_s22  ;;  %s44_s24 = sadd.s32 1, %s1870_s22  ;;  %s1874_s23 = sphi %s1925_s23, %s25_s23   ;;  %s1870_s22 = sphi %s1923_s22, %s2251_s22   ;;  %s1866_s21 = sphi %s1921_s21, %s2250_s21   ;;  %s1862_s20 = sphi %s1919_s20, %s2254_s20   ;;  %s1858_s19 = sphi %s1917_s19, %s2253_s19   ;;  %s1854_s18 = sphi %s1915_s18, %s2252_s18  }
   0xd   : > { %s55_s25 = sadd.s32 1, %s1862_s20  ;;  %p46_p0 = scmp.ge.s32.totalorder %s44_s24, 2 }
   0xe   : > { %p62_p1 = scmp.ne.s32.totalorder %s1862_s20, %s1858_s19  ;;  %p63_p2 = scmp.eq.s32.totalorder %s1874_s23, 0 }
   0xf   : > { %s2256_s24 = smov (%p46_p0, %s44_s24), 0  ;;  %p1604_p6 = scmp.lt.s32.totalorder %s1874_s23, 2 }
  0x10   : > { %2231 = sst [smem:[#allocation17_spill]] %s2256_s24  ;;  %p64_p3 = por %p63_p2, %p62_p1 }
  0x11   : > { %s50_s26 = ssub.s32 %s1870_s22, %s2256_s24  ;;  %s2223_s27 = sand.u32 1, %s1862_s20  }
  0x12   : > { %p53_p5 = scmp.eq.s32.totalorder %s50_s26, 0  ;;  %s1961_s28 = sshll.u32 %s1870_s22, 9 }
  0x13   : > { %s1968_s30 = sshll.u32 %s2223_s27, 5  ;;  %p1970_p7 = pnand %p1604_p6, %p64_p3 }
  0x14   : > { %s1964_s29 = scalar_select %p53_p5, %s1862_s20, %s55_s25  }
  0x15   : > { %s253_s7 = sand.u32 1, %s1874_s23   ;;  %s2234_s1 = sld [smem:[#allocation20_spill]] }
  0x16   : > { %2232 = sst [smem:[#allocation18_spill]] %s1964_s29  ;;  %s257_s11 = scalar_lea.vmem [#allocation6], %s1968_s30 }
  0x17   : > { %s264_s12 = sshll.u32 %s257_s11, 4  ;;  %s1980_s13 = scalar_lea.sflag [#allocation7], %s253_s7  ;;  %s265_s12 = int_to_ptr.vmem [resolvable:$true] %s264_s12 }
  0x18   : > { %p2227_p8 = pneg %p1970_p7  ;;  %s1689_s14 = scalar_lea.vmem %s265_s12, 512 }
  0x19   : > { %p1690_p9 = scmp.ne.s32.totalorder %s265_s12, %s1689_s14  ;;  %s1876_s15 = smov [#allocation6]  }
  0x1a   : > { %s1694_s16 = sshll.u32 %s1876_s15, 4  ;;  %s1695_s16 = int_to_ptr.vmem [resolvable:$false] %s1694_s16 }
  0x1b   : > { %s263_s10 = scalar_lea.hbm %s2234_s1, %s1961_s28  ;;  %p1692_p10 = pnand %p1690_p9, %p2227_p8 }
  0x1c   : > { %s1696_s17 = scalar_lea.vmem %s1695_s16, 1024  ;;  %p1697_p12 = scmp.lt.s32.totalorder %s265_s12, %s1695_s16 }
  0x1d   : > { %p1693_p11 = pneg %p1692_p10  ;;  %p1698_p13 = scmp.lt.s32.totalorder %s1696_s17, %s1689_s14 }
  0x1f   : > { %p1699_p0 = por %p1698_p13, %p1697_p12 }
  0x21   : > { %p1700_p2 = pnand %p1699_p0, %p1693_p11 }
  0x23   : > { %1703 = shalt.err (!%p1700_p2)
}
  0x24   : > { %s2219_s25 = smov 128   ;;  %s2221_s26 = smov 8  }
  0x25   : > { %1595 = dma.hbm_to_vmem [thread:$0]  (!%p1970_p7), %s263_s10, 512, %s265_s12, %s1980_s13, %s2219_s25, %s2219_s25, %s2221_s26  }
  0x26   : > { %s1994_s7 = sadd.s32 4294967295, %s1874_s23   ;;  %s1457_s8 = sadd.s32 4294967294, %s1874_s23  }
  0x27   : > { %p68_p3 = scmp.ne.s32.totalorder %s1858_s19, %s1854_s18  ;;  %p2226_p5 = scmp.eq.s32.totalorder %s1994_s7, 0 }
  0x28   : > { %p188_p6 = scmp.eq.s32.totalorder %s1994_s7, 1  ;;  %p194_p9 = scmp.eq.s32.totalorder %s1457_s8, 1 }
  0x29   : > { %p1458_p10 = scmp.ge.s32.totalorder %s1874_s23, 1  ;;  %p2004_p11 = por %p2226_p5, %p68_p3 }
  0x2a   : > { %p2011_p12 = por %p188_p6, %p62_p1  ;;  %p2015_p13 = por %p194_p9, %p68_p3 }
  0x2b   : > { %p201_p0 = scmp.lt.s32.totalorder %s1874_s23, 3  ;;  %s1879_s14 = smov [#allocation9]  }
  0x2c   : > { %s2237_s11 = scalar_select %p2015_p13, 1, 0 }
  0x2d   : > { %p2020_p2 = pnand %p1458_p10, %p201_p0  ;;  %s213_s15 = sshll.u32 %s1879_s14, 4  ;;  %s2024_s15 = int_to_ptr.vmem [resolvable:$true] %s213_s15 }
  0x2e   : > { %s2239_s0 = sld [smem:[#allocation19_spill]]  ;;  %s234_s25 = scalar_lea.vmem [#allocation3], %s1968_s30 }
  0x2f   : > { %p1585_p1 = pneg %p2020_p2  ;;  %s243_s26 = sshll.u32 %s234_s25, 4  ;;  %s244_s26 = int_to_ptr.vmem [resolvable:$true] %s243_s26 }
  0x30   : > { %s2241_s1 = sand.u32 1, %s1862_s20   ;;  %s1717_s22 = scalar_lea.vmem %s244_s26, 512 }
  0x31   : > { %p2035_p3 = pnand %p1585_p1, %p2226_p5  ;;  %s231_s24 = scalar_lea.sflag [#allocation4], %s2241_s1 }
  0x32   : > { %p1718_p6 = scmp.ne.s32.totalorder %s244_s26, %s1717_s22  ;;  %s1880_s14 = smov [#allocation3]  }
  0x33   : > { %s1722_s29 = sshll.u32 %s1880_s14, 4  ;;  %s1723_s29 = int_to_ptr.vmem [resolvable:$false] %s1722_s29 }
  0x34   : > { %s242_s8 = scalar_lea.hbm %s2239_s0, %s1961_s28  ;;  %p1720_p9 = pnand %p1718_p6, %p2227_p8 }
  0x35   : > { %s1724_s16 = scalar_lea.vmem %s1723_s29, 1024  ;;  %p1725_p0 = scmp.lt.s32.totalorder %s244_s26, %s1723_s29 }
  0x36   : > { %p1721_p10 = pneg %p1720_p9  ;;  %p1726_p4 = scmp.lt.s32.totalorder %s1724_s16, %s1717_s22 }
  0x38   : > { %p1727_p13 = por %p1726_p4, %p1725_p0 }
  0x3a   : > { %p1728_p1 = pnand %p1727_p13, %p1721_p10 }
  0x3c   : > { %1731 = shalt.err (!%p1728_p1)
}
  0x3d   : > { %s2242_s25 = smov 8   ;;  %s2243_s17 = smov 128  }
  0x3e   : > { %1592 = dma.hbm_to_vmem [thread:$0]  (!%p1970_p7), %s242_s8, 512, %s244_s26, %s231_s24, %s2243_s17, %s2243_s17, %s2242_s25  }
  0x3f   : > { %p1734_p6 = pneg %p2035_p3  ;;  %s1743_s1 = scalar_lea.vmem %s2024_s15, 512 }
  0x40   : > { %p1744_p9 = scmp.ne.s32.totalorder %s2024_s15, %s1743_s1  ;;  %p1751_p4 = scmp.lt.s32.totalorder %s2024_s15, %s2024_s15 }
  0x41   : > { %p1752_p13 = scmp.lt.s32.totalorder %s1743_s1, %s1743_s1 }
  0x42   : > { %p1746_p5 = pnand %p1744_p9, %p1734_p6 }
  0x43   : > { %p1753_p10 = por %p1752_p13, %p1751_p4 }
  0x44   : > { %p1747_p8 = pneg %p1746_p5 }
  0x46   : > { %p1754_p0 = pnand %p1753_p10, %p1747_p8 }
  0x48   : > { %1757 = shalt.err (!%p1754_p0)
}
  0x49   : > { %1588 = dma.hbm_to_vmem [thread:$0]  (!%p2035_p3), %s2216_s3, 512, %s2024_s15, [#allocation10], %s2243_s17, %s2243_s17, %s2242_s25  }
  0x4a   : > { %s284_s8 = scalar_lea.hbm %s2215_s2, %s1961_s28  ;;  %s278_s14 = scalar_lea.vmem [#allocation8], %s1968_s30 }
  0x4b   : > { %s285_s16 = sshll.u32 %s278_s14, 4  ;;  %p2244_p5 = pneg %p1970_p7  ;;  %s286_s16 = int_to_ptr.vmem [resolvable:$true] %s285_s16 }
  0x4c   : > { %s1771_s1 = scalar_lea.vmem %s286_s16, 512  ;;  %s1881_s27 = smov [#allocation8]  }
  0x4d   : > { %p1772_p8 = scmp.ne.s32.totalorder %s286_s16, %s1771_s1  ;;  %s1776_s0 = sshll.u32 %s1881_s27, 4  ;;  %s1777_s0 = int_to_ptr.vmem [resolvable:$false] %s1776_s0 }
  0x4e   : > { %s1778_s22 = scalar_lea.vmem %s1777_s0, 1024  ;;  %p1779_p9 = scmp.lt.s32.totalorder %s286_s16, %s1777_s0 }
  0x4f   : > { %p1774_p1 = pnand %p1772_p8, %p2244_p5  ;;  %p1780_p4 = scmp.lt.s32.totalorder %s1778_s22, %s1771_s1 }
  0x51   : > { %p1775_p6 = pneg %p1774_p1  ;;  %p1781_p3 = por %p1780_p4, %p1779_p9 }
  0x53   : > { %p1782_p13 = pnand %p1781_p3, %p1775_p6 }
  0x55   : > { %1785 = shalt.err (!%p1782_p13)
}
  0x56   : > { %1598 = dma.hbm_to_vmem [thread:$0]  (!%p1970_p7), %s284_s8, 512, %s286_s16, %s1980_s13, %s2243_s17, %s2243_s17, %s2242_s25  }
  0x57   : > { %297 = sbr.rel (%p2020_p2) target bundleno = 1172 (0x494), region = 40  ;;  %s2081_s28 = sand.u32 (!%p2020_p2), 1, %s1858_s19  }
  0x58   : > { %s1471_s0 = sshll.u32 (!%p2020_p2), %s2081_s28, 5  ;;  %s300_s30 = scalar_lea.sflag (!%p2020_p2), [#allocation4], %s2081_s28 }
  0x59   : > { %s2085_s15 = scalar_lea.vmem (!%p2020_p2), [#allocation3], %s1471_s0 }
  0x5c   : > { %1837 = dma.done.wait (%p2004_p11), %s300_s30, 512  }
  0x5d   : > { %1839 = vsyncadd (%p2004_p11), %s300_s30, 4294966784  ;;  %s308_s6 = sand.u32 1, %s1994_s7   ;;  %s312_s12 = scalar_lea.vmem [#allocation6], %s1471_s0 }
  0x5e   : > { %s309_s13 = scalar_lea.sflag [#allocation7], %s308_s6 }
  0x5f   : > { %1841 = dma.done.wait (%p2004_p11), %s309_s13, 1024  }
  0x60   : > { %1843 = vsyncadd (%p2004_p11), %s309_s13, 4294966272  ;;  %s2096_s25 = scalar_lea.vmem [#allocation8], %s1471_s0  ;;  %p2245_p7 = scmp.eq.s32.totalorder %s1994_s7, 0 }
  0x62   : > { %1845 = dma.done.wait (%p2245_p7), [#allocation10], 512   ;;  %p2246_p2 = pmov %p2245_p7 }
  0x63   : > { %v1882_v0 = vmov 0.0   ;;  %vm1883_vm0 = vmmov 0   ;;  %vm388_vm1 = vcmask 64512   ;;  %v379_v1 = vld [vmem:[%s312_s12] sm:$0xff]  ;;  %v381_v2 = vld [vmem:[%s312_s12 + $0x10] sm:$0xff]  ;;  %v380_v5 = vld [vmem:[%s312_s12 + $0x8] sm:$0xff] }
  0x64   : > { %1847 = vsyncadd (%p2246_p2), [#allocation10], 4294966784  ;;  %1522 = vmatprep.subr.mxu1 %v1882_v0  ;;  %1532 = vmatprep.subr.mxu0 %v1882_v0  ;;  %v373_v3 = vld [vmem:[%s2085_s15] sm:$0xff]  ;;  %v375_v4 = vld [vmem:[%s2085_s15 + $0x10] sm:$0xff]  ;;  %vm370_vm2 = vcmask 261120   ;;  %s1475_s7 = sshll.u32 %s2081_s28, 3 }
  0x65   : > { %1524 = vmatprep.mubr.msk.f32.mxu1 %vm1883_vm0, %v1882_v0  ;;  %1534 = vmatprep.mubr.msk.f32.mxu0 %vm1883_vm0, %v1882_v0  ;;  %v374_v6 = vld [vmem:[%s2085_s15 + $0x8] sm:$0xff]  ;;  %v382_v7 = vld [vmem:[%s312_s12 + $0x18] sm:$0xff]  ;;  %v384_v41 = vld [vmem:[%s2096_s25] sm:$0xff]  ;;  %371 = vst.msk [vmem:[#allocation2] sm:$0xff] %vm370_vm2, %v1882_v0  ;;  %s1495_s24 = sshll.u32 %s1866_s21, 7  ;;  %s361_s29 = scalar_lea.vmem [#allocation11], %s1475_s7 }
  0x66   : > { %1523 = vmatpush3.xpose.msk.msra.mxu1 %vm388_vm1, %v379_v1  ;;  %1533 = vmatpush3.xpose.msk.msra.mxu0 %vm388_vm1, %v381_v2  ;;  %v376_v8 = vld [vmem:[%s2085_s15 + $0x18] sm:$0xff]  ;;  %v386_v42 = vld [vmem:[%s2096_s25 + $0x10] sm:$0xff]  ;;  %v385_v44 = vld [vmem:[%s2096_s25 + $0x8] sm:$0xff]  ;;  %s1312_s26 = sshll.u32 %s361_s29, 4  ;;  %s1310_s16 = scalar_lea.hbm %s2218_s5, %s1495_s24  ;;  %s1313_s26 = int_to_ptr.vmem [resolvable:$true] %s1312_s26 }
  0x67   : > { %1527 = vmatprep.subr.mxu1 %v1882_v0  ;;  %1542 = vmatprep.subr.mxu0 %v1882_v0  ;;  %v387_v43 = vld [vmem:[%s2096_s25 + $0x18] sm:$0xff]  ;;  %v1173_v62 = vld [vmem:[#allocation9 + $0x10] sm:$0xff]  ;;  %v1172_v63 = vld [vmem:[#allocation9 + $0x8] sm:$0xff]  ;;  %s1298_s1 = scalar_lea.sflag [#allocation5], %s2081_s28  ;;  %s1786_s27 = scalar_lea.vmem %s1313_s26, 128 }
  0x68   : > { %v1174_v61 = vld [vmem:[#allocation9 + $0x18] sm:$0xff]  ;;  %v1171_v1 = vld [vmem:[#allocation9] sm:$0xff]  ;;  %p1787_p11 = scmp.ne.s32.totalorder %s1313_s26, %s1786_s27  ;;  %s1884_s22 = smov [#allocation11]  }
  0x69   : > { %1525 = vmatmul.mubr.msk.f32.vlgmr.msra.gmra.mxu1 %vm388_vm1, %v373_v3  ;;  %1535 = vmatmul.mubr.msk.f32.vlgmr.msra.gmra.mxu0 %vm388_vm1, %v375_v4  ;;  %s1790_s0 = sshll.u32 %s1884_s22, 4  ;;  %s1791_s0 = int_to_ptr.vmem [resolvable:$false] %s1790_s0 }
  0x6a   : > { %1528 = vmatpush3.xpose.msk.msra.mxu1 %vm388_vm1, %v380_v5  ;;  %1529 = vmatprep.mubr.msk.f32.mxu1 %vm1883_vm0, %v1882_v0  ;;  %p1788_p10 = pnand %p1787_p11, %p2011_p12  ;;  %s1792_s21 = scalar_lea.vmem %s1791_s0, 256 }
  0x6b   : > { %1537 = vmatprep.subr.mxu1 %v1882_v0  ;;  %1544 = vmatprep.mubr.msk.f32.mxu0 %vm1883_vm0, %v1882_v0  ;;  %p1793_p8 = scmp.lt.s32.totalorder %s1313_s26, %s1791_s0  ;;  %p1794_p5 = scmp.lt.s32.totalorder %s1792_s21, %s1786_s27 }
  0x6c   : > { %p1789_p0 = pneg %p1788_p10 }
  0x6d   : > { %1530 = vmatmul.mubr.msk.f32.vlgmr.msra.gmra.mxu1 %vm388_vm1, %v374_v6  ;;  %p1795_p1 = por %p1794_p5, %p1793_p8 }
  0x6e   : > { %1538 = vmatpush3.xpose.msk.msra.mxu1 %vm388_vm1, %v382_v7  ;;  %1539 = vmatprep.mubr.msk.f32.mxu1 %vm1883_vm0, %v1882_v0 }
  0x6f   : > { %1547 = vmatprep.subr.mxu1 %v1882_v0  ;;  %p1796_p6 = pnand %p1795_p1, %p1789_p0 }
  0x71   : > { %1540 = vmatmul.mubr.msk.f32.vlgmr.msra.gmra.mxu1 %vm388_vm1, %v376_v8 }
  0x72   : > { %1549 = vmatprep.mubr.msk.f32.mxu1 %vm1883_vm0, %v1882_v0 }
 0x129   : > { %v461_v9 = vpop.f32.mrf.mxu1  ;;  %v613_v10 = vpop.f32.mrf.mxu0 }
 0x12a   : > { %v699_v11 = vsel %vm388_vm1, %v613_v10, -inf  ;;  %v693_v12 = vsel %vm388_vm1, %v461_v9, -inf }
 0x12b   : > { %700 = vmax.xlane.f32.xlu1 %v699_v11  ;;  %694 = vmax.xlane.f32.xlu0 %v693_v12  ;;  %v1526_v13 = vpop.f32.mrf.mxu1  ;;  %v1536_v14 = vpop.f32.mrf.mxu0  ;;  %v1175_v11 = vld [vmem:[#allocation2] sm:$0xff] }
 0x12c   : > { %v1493_v14 = vld [vmem:[%s2217_s4] ss:$0 sm:$0xff] }
 0x12d   : > { %v537_v15 = vpop.f32.mrf.mxu1 }
 0x12e   : > { %v696_v16 = vsel %vm388_vm1, %v537_v15, -inf }
 0x12f   : > { %697 = vmax.xlane.f32.xlu0 %v696_v16  ;;  %v1531_v17 = vpop.f32.mrf.mxu1 }
 0x131   : > { %v689_v18 = vpop.f32.mrf.mxu1 }
 0x132   : > { %v702_v19 = vsel %vm388_vm1, %v689_v18, -inf }
 0x133   : > { %703 = vmax.xlane.f32.xlu1 %v702_v19  ;;  %v1541_v20 = vpop.f32.mrf.mxu1 }
 0x1b4   : > { %v701_v21 = vpop.xlane.xlu1 %700  ;;  %v695_v22 = vpop.xlane.xlu0 %694 }
 0x1b5   : > { %v707_v23 = vsub.f32 %v613_v10, %v701_v21  ;;  %v705_v24 = vsub.f32 %v461_v9, %v695_v22 }
 0x1b7   : > { %v709_v25 = vmul.f32 1.442695, %v705_v24  ;;  %v713_v26 = vmul.f32 1.442695, %v707_v23 }
 0x1b8   : > { %v698_v27 = vpop.xlane.xlu0 %697 }
 0x1b9   : > { %v706_v28 = vsub.f32 %v537_v15, %v698_v27  ;;  %1660 = vpow2.f32 %v709_v25 }
 0x1ba   : > { %1662 = vpow2.f32 %v713_v26 }
 0x1bb   : > { %v711_v29 = vmul.f32 1.442695, %v706_v28 }
 0x1bc   : > { %v704_v30 = vpop.xlane.xlu1 %703 }
 0x1bd   : > { %1664 = vpow2.f32 %v711_v29  ;;  %v708_v31 = vsub.f32 %v689_v18, %v704_v30 }
 0x1bf   : > { %v715_v32 = vmul.f32 1.442695, %v708_v31 }
 0x1c1   : > { %1666 = vpow2.f32 %v715_v32 }
 0x1c6   : > { %v1661_v33 = vpop.eup %1660 }
 0x1c7   : > { %v717_v34 = vsel %vm388_vm1, %v1661_v33, 0.0  ;;  %v1663_v35 = vpop.eup %1662 }
 0x1c8   : > { %718 = vadd.xlane.f32.xlu0 %v717_v34  ;;  %v723_v38 = vsel %vm388_vm1, %v1663_v35, 0.0 }
 0x1ca   : > { %v1665_v36 = vpop.eup %1664 }
 0x1cb   : > { %v720_v37 = vsel %vm388_vm1, %v1665_v36, 0.0 }
 0x1cc   : > { %721 = vadd.xlane.f32.xlu1 %v720_v37  ;;  %724 = vadd.xlane.f32.xlu0 %v723_v38 }
 0x1ce   : > { %v1667_v39 = vpop.eup %1666 }
 0x1cf   : > { %v726_v40 = vsel %vm388_vm1, %v1667_v39, 0.0 }
 0x1d0   : > { %727 = vadd.xlane.f32.xlu1 %v726_v40 }
 0x1f9   : > { %737 = vxpose.xlu0.b32.start.end [1/1] (short) (narrow) %v384_v41, 8 }
 0x1fd   : > { %953 = vxpose.xlu0.b32.start.end [1/1] (short) (narrow) %v386_v42, 8 }
 0x201   : > { %1061 = vxpose.xlu0.b32.start.end [1/1] (short) (narrow) %v387_v43, 8 }
 0x203   : > { %845 = vxpose.xlu1.b32.start.end [1/1] (short) (narrow) %v385_v44, 8 }
 0x251   : > { %v719_v45 = vpop.xlane.xlu0 %718 }
 0x252   : > { %1668 = vrcp.f32 %v719_v45 }
 0x255   : > { %v722_v46 = vpop.xlane.xlu1 %721  ;;  %v725_v50 = vpop.xlane.xlu0 %724 }
 0x256   : > { %1670 = vrcp.f32 %v722_v46 }
 0x257   : > { %1672 = vrcp.f32 %v725_v50 }
 0x259   : > { %v728_v52 = vpop.xlane.xlu1 %727 }
 0x25a   : > { %1674 = vrcp.f32 %v728_v52 }
 0x25f   : > { %v1669_v47 = vpop.eup %1668 }
 0x260   : > { %v730_v48 = vmul.f32 %v1669_v47, %v1661_v33 }
 0x262   : > { %1543 = vmatpush3.xpose.msk.msra.mxu0 %vm388_vm1, %v730_v48 }
 0x263   : > { %v1671_v49 = vpop.eup %1670  ;;  %1552 = vmatprep.subr.mxu0 %v1882_v0 }
 0x264   : > { %v732_v51 = vmul.f32 %v1671_v49, %v1665_v36  ;;  %v1673_v53 = vpop.eup %1672 }
 0x265   : > { %v734_v55 = vmul.f32 %v1673_v53, %v1663_v35 }
 0x266   : > { %1548 = vmatpush3.xpose.msk.msra.mxu1 %vm388_vm1, %v732_v51 }
 0x267   : > { %1557 = vmatprep.subr.mxu1 %v1882_v0  ;;  %v1675_v57 = vpop.eup %1674 }
 0x268   : > { %v736_v59 = vmul.f32 %v1675_v57, %v1667_v39 }
 0x275   : > { %v753_v54 = vpop.trf.xlu0 }
 0x276   : > { %1545 = vmatmul.mubr.msk.f32.vlgmr.msra.gmra.mxu0 %vm388_vm1, %v753_v54 }
 0x277   : > { %1553 = vmatpush3.xpose.msk.msra.mxu0 %vm388_vm1, %v734_v55  ;;  %1554 = vmatprep.mubr.msk.f32.mxu0 %vm1883_vm0, %v1882_v0 }
 0x278   : > { %1562 = vmatprep.subr.mxu0 %v1882_v0 }
 0x279   : > { %v969_v56 = vpop.trf.xlu0 }
 0x27a   : > { %1555 = vmatmul.mubr.msk.f32.vlgmr.msra.gmra.mxu0 %vm388_vm1, %v969_v56 }
 0x27b   : > { %1570 = vmatprep.mubr.msk.f32.mxu0 %vm1883_vm0, %v1882_v0  ;;  %1563 = vmatpush3.msra.mxu0 %v1174_v61 }
 0x27c   : > { %1564 = vmatprep.subr.mxu0 %v1882_v0 }
 0x27d   : > { %v1077_v60 = vpop.trf.xlu0  ;;  %1565 = vmatpush3.msra.mxu0 %v1173_v62 }
 0x27e   : > { %1566 = vmatprep.subr.mxu0 %v1882_v0 }
 0x27f   : > { %v861_v58 = vpop.trf.xlu1  ;;  %1567 = vmatpush3.msra.mxu0 %v1172_v63 }
 0x280   : > { %1550 = vmatmul.mubr.msk.f32.vlgmr.msra.gmra.mxu1 %vm388_vm1, %v861_v58  ;;  %1568 = vmatprep.subr.mxu0 %v1882_v0 }
 0x281   : > { %1558 = vmatpush3.xpose.msk.msra.mxu1 %vm388_vm1, %v736_v59  ;;  %1559 = vmatprep.mubr.msk.f32.mxu1 %vm1883_vm0, %v1882_v0 }
 0x282   : > { %1569 = vmatpush3.msra.mxu0 %v1171_v1 }
 0x284   : > { %1560 = vmatmul.mubr.msk.f32.vlgmr.msra.gmra.mxu1 %vm388_vm1, %v1077_v60 }
 0x336   : > { %v841_v2 = vpop.f32.mrf.mxu0 }
 0x337   : > { %1176 = vxpose.xlu1.b32.start [1/4] (short) (narrow) %v841_v2, 8 }
 0x338   : > { %v1546_v3 = vpop.f32.mrf.mxu0 }
 0x33a   : > { %v1057_v4 = vpop.f32.mrf.mxu0 }
 0x33c   : > { %v1556_v5 = vpop.f32.mrf.mxu0 }
 0x340   : > { %v949_v6 = vpop.f32.mrf.mxu1 }
 0x341   : > { %1177 = vxpose.xlu1.b32.cont [2/4] (short) (narrow) %v949_v6, 8 }
 0x342   : > { %v1551_v7 = vpop.f32.mrf.mxu1 }
 0x344   : > { %v1165_v8 = vpop.f32.mrf.mxu1 }
 0x345   : > { %1178 = vxpose.xlu1.b32.cont [3/4] (short) (narrow) %v1057_v4, 8 }
 0x346   : > { %v1561_v9 = vpop.f32.mrf.mxu1 }
 0x349   : > { %1179 = vxpose.xlu1.b32.end [4/4] (short) (narrow) %v1165_v8, 8 }
 0x3b9   : > { %v1192_v10 = vpop.trf.xlu1 }
 0x3ba   : > { %1571 = vmatmul.mubr.msk.f32.vlgmr.msra.gmra.mxu0 %vm370_vm2, %v1192_v10 }
 0x47a   : > { %v1278_v12 = vpop.f32.mrf.mxu0 }
 0x47b   : > { %v1282_v13 = vadd.f32 %v1278_v12, %v1175_v11 }
 0x47c   : > { %v1572_v0 = vpop.f32.mrf.mxu0 }
 0x47d   : > { %1283 = vst.msk [vmem:[#allocation2] sm:$0xff] %vm370_vm2, %v1282_v13 }
 0x484   : > { %v1287_v15 = vld [vmem:[#allocation2] sm:$0xff] }
 0x485   : > { %v1295_v16 = vadd.f32 %v1493_v14, %v1287_v15 }
 0x487   : > { %1296 = vst.msk [vmem:[%s361_s29] sm:$0xff] %vm370_vm2, %v1295_v16 }
 0x488   : > { %1799 = shalt.err (!%p1796_p6)
}
 0x489   : > { %s1800_s30 = scalar_lea.hbm %s1310_s16, 128  ;;  %s1804_s6 = scalar_lea.hbm %s2218_s5, 256 }
 0x48a   : > { %p1801_p9 = scmp.ne.s32.totalorder %s1310_s16, %s1800_s30  ;;  %p1805_p13 = scmp.lt.s32.totalorder %s1310_s16, %s2218_s5 }
 0x48b   : > { %p1806_p7 = scmp.lt.s32.totalorder %s1804_s6, %s1800_s30 }
 0x48c   : > { %p1802_p4 = pnand %p1801_p9, %p2011_p12 }
 0x48d   : > { %p1807_p2 = por %p1806_p7, %p1805_p13 }
 0x48e   : > { %p1803_p3 = pneg %p1802_p4 }
 0x490   : > { %p1808_p11 = pnand %p1807_p2, %p1803_p3 }
 0x492   : > { %1811 = shalt.err (!%p1808_p11)
}
 0x493   : > { %1583 = dma.vmem_to_hbm [thread:$0]  (%p2011_p12), %s1313_s26, 128, %s1310_s16, %s1298_s1  }
 0x494 PF: > { %s1324_s25 = sand.u32 1, %s1854_s18   ;;  %p2247_p10 = scmp.ne.s32.totalorder %s2237_s11, 0 }
 0x495   : > { %p2248_p0 = scmp.ge.s32.totalorder %s1874_s23, 2  ;;  %s1325_s7 = scalar_lea.sflag [#allocation5], %s1324_s25 }
 0x497   : > { %p1600_p8 = pnand %p2248_p0, %p2247_p10 }
 0x499   : > { %p1601_p5 = pneg %p1600_p8 }
 0x49b   : > { %1849 = dma.done.wait (%p1601_p5), %s1325_s7, 128  }
 0x49c   : > { %1851 = vsyncadd (%p1601_p5), %s1325_s7, 4294967168  ;;  %s25_s23 = sadd.s32 1, %s1874_s23   ;;  %s2249_s9 = sld [smem:[#allocation18_spill]] }
 0x49d   : > { %p22_p1 = scmp.ge.s32.totalorder %s25_s23, 4   ;;  %s2250_s21 = sld [smem:[#allocation16_spill]] }
 0x49e   : > { %s2251_s22 = sld [smem:[#allocation17_spill]]  ;;  %s2252_s18 = smov %s1858_s19 }
 0x49f   : > { %s2253_s19 = smov %s1862_s20  ;;  %24 = sbr.rel (!%p22_p1) target bundleno = 12 (0xc), region = 124 }
 0x4a2   : > { %s2254_s20 = smov %s2249_s9 }
 0x4a4   :  { %1330 = vsyncpa [#allocation4], 1 }
 0x4a5   :  { %1332 = vsyncpa [#allocation4 + $0x1], 1 }
 0x4a6   :  { %1333 = vsyncpa [#allocation7], 1 }
 0x4a7   :  { %1335 = vsyncpa [#allocation7 + $0x1], 1 }
 0x4a8   :  { %1336 = vsyncpa [#allocation10], 1 }
 0x4a9   :  { %1337 = vsyncpa [#allocation5], 1 }
 0x4aa   :  { %1339 = vsyncpa [#allocation5 + $0x1], 1 }

</bundles_post_ra>
